<compile_context>
chip_gen: v6e
topology: v6e:2x2x1
jax: 0.10.0
libtpu: 0.0.40
codegen_flags: <defaults>
</compile_context>

<pallas_src>
import math

import jax
import jax.numpy as jnp
from jax.experimental import pallas as pl
from jax.experimental.pallas import tpu as pltpu


def _round_up(x, m):
    return ((x + m - 1) // m) * m


def _make_mha_kernel(*, n_head, write_attn, scale, eps, matmul_dtype, exp_dtype):
    def mm(a, b):
        return jnp.dot(a.astype(matmul_dtype), b.astype(matmul_dtype),
                       preferred_element_type=jnp.float32)

    def kernel(qh_ref, kh_ref, vh_ref, res_ref, wfc_ref, gamma_ref, beta_ref,
               *out_and_scratch):
        if write_attn:
            out_ref, attn_ref, acc_ref = out_and_scratch
        else:
            out_ref, acc_ref = out_and_scratch
            attn_ref = None

        h = pl.program_id(2)

        @pl.when(h == 0)
        def _init():
            acc_ref[...] = jnp.zeros_like(acc_ref)

        q_h = qh_ref[0]      # (TQ, d_k)  matmul_dtype
        k_h = kh_ref[h]      # (Lk, d_k)  head slab via dynamic leading-axis index
        v_h = vh_ref[h]      # (Lk, d_v)

        # scores = (q / temperature) @ k^T  (scale applied to the f32 scores).
        s = jax.lax.dot_general(
            q_h, k_h, (((1,), (1,)), ((), ())),
            preferred_element_type=jnp.float32) * scale          # (TQ, Lk) f32

        m = jnp.max(s, axis=-1, keepdims=True)
        e = jnp.exp((s - m).astype(exp_dtype)).astype(jnp.float32)
        denom = jnp.sum(e, axis=-1, keepdims=True)
        # approx reciprocal on the EUP: rows sum to 1 within ~1e-3 relative error.
        p = e * pl.reciprocal(denom, approx=True)                # softmax, f32

        if write_attn:
            attn_ref[0] = p.astype(attn_ref.dtype)    # lane-dense (TQ, Lk) store

        ctx = mm(p, v_h)                         # (TQ, d_v) f32
        acc_ref[...] += mm(ctx, wfc_ref[h])      # per-head fc contribution, (TQ, D)

        @pl.when(h == n_head - 1)
        def _finalize():
            out = acc_ref[...] + res_ref[...].astype(jnp.float32)  # residual (dropout=id)
            mu = jnp.mean(out, axis=-1, keepdims=True)
            var = jnp.mean(jnp.square(out - mu), axis=-1, keepdims=True)
            y = (out - mu) * jax.lax.rsqrt(var + eps)
            out_ref[...] = (y * gamma_ref[...] + beta_ref[...]).astype(out_ref.dtype)

    return kernel


def multi_head_attention(q, k, v, params, *, n_head, d_k, d_v, eps=1e-6,
                         matmul_dtype=jnp.bfloat16, exp_dtype=None,
                         attn_dtype=jnp.bfloat16, return_attn=True, q_tile=None):
    """params: wq/wk/wv (d_model, n_head*d_k|d_v), wfc (n_head*d_v, d_model),
    gamma/beta (d_model,). Weights are the transposed PyTorch Linear weights so the
    computation is x @ W (== x @ W_pt.T)."""
    B, Lq, D = q.shape
    Lk = k.shape[1]
    assert k.shape == (B, Lk, D) and v.shape == (B, Lk, D)

    if exp_dtype is None:
        # bf16 exp for the v6e/v7x EUP; pass exp_dtype=jnp.float32 on v5e (no bf16 EUP).
        exp_dtype = (jnp.bfloat16 if jnp.dtype(matmul_dtype) == jnp.dtype(jnp.bfloat16)
                     else jnp.float32)

    # ---- Hoisted full-width projections: one XLA matmul each, done once. ----
    qp = (q @ params["wq"]).reshape(B, Lq, n_head, d_k).transpose(0, 2, 1, 3)
    kp = (k @ params["wk"]).reshape(B, Lk, n_head, d_k).transpose(0, 2, 1, 3)
    vp = (v @ params["wv"]).reshape(B, Lk, n_head, d_v).transpose(0, 2, 1, 3)
    qp = qp.astype(matmul_dtype)
    kp = kp.astype(matmul_dtype)
    vp = vp.astype(matmul_dtype)
    wfc_h = params["wfc"].reshape(n_head, d_v, D).astype(matmul_dtype)   # (H, d_v, D)
    gamma2d = params["gamma"].reshape(1, D).astype(jnp.float32)
    beta2d = params["beta"].reshape(1, D).astype(jnp.float32)
    resid = q

    # ---- q-tile selection + padding (never collapse to one giant tile). ----
    try:
        phys_vmem = int(pltpu.get_tpu_info().vmem_capacity_bytes)
    except Exception:
        phys_vmem = 64 << 20                                # v7x-safe fallback
    if q_tile is None:
        q_tile = 256 if phys_vmem >= (96 << 20) else 128    # 256 on v5e/v6e, 128 on v7x
    tq = min(q_tile, _round_up(Lq, 8))
    if B * ((Lq + tq - 1) // tq) < 2 and Lq >= 16:
        tq = _round_up((Lq + 1) // 2, 8)                    # keep both v7x TCs busy
    Lq_pad = _round_up(Lq, tq)
    n_qt = Lq_pad // tq
    if Lq_pad != Lq:
        pad = Lq_pad - Lq
        qp = jnp.pad(qp, ((0, 0), (0, 0), (0, pad), (0, 0)))
        resid = jnp.pad(resid, ((0, 0), (0, pad), (0, 0)))

    grid = (B, n_qt, n_head)

    in_specs = [
        pl.BlockSpec((None, 1, tq, d_k), lambda b, t, h: (b, h, t, 0)),       # Q proj tile
        pl.BlockSpec((None, n_head, Lk, d_k), lambda b, t, h: (b, 0, 0, 0)),  # K proj (per-batch resident)
        pl.BlockSpec((None, n_head, Lk, d_v), lambda b, t, h: (b, 0, 0, 0)),  # V proj (per-batch resident)
        pl.BlockSpec((None, tq, D), lambda b, t, h: (b, t, 0)),               # residual
        pl.BlockSpec((n_head, d_v, D), lambda b, t, h: (0, 0, 0)),            # fc weight (grid-resident)
        pl.BlockSpec((1, D), lambda b, t, h: (0, 0)),                         # gamma
        pl.BlockSpec((1, D), lambda b, t, h: (0, 0)),                         # beta
    ]

    out_dtype = q.dtype
    out_shapes = [jax.ShapeDtypeStruct((B, Lq_pad, D), out_dtype)]
    out_specs = [pl.BlockSpec((None, tq, D), lambda b, t, h: (b, t, 0))]
    if return_attn:
        out_shapes.append(jax.ShapeDtypeStruct((B, n_head, Lq_pad, Lk), attn_dtype))
        out_specs.append(pl.BlockSpec((None, 1, tq, Lk), lambda b, t, h: (b, h, t, 0)))

    kernel = _make_mha_kernel(n_head=n_head, write_attn=return_attn,
                              scale=1.0 / math.sqrt(d_k), eps=eps,
                              matmul_dtype=matmul_dtype, exp_dtype=exp_dtype)

    itm_mm = jnp.dtype(matmul_dtype).itemsize
    itm_in = jnp.dtype(q.dtype).itemsize
    itm_out = jnp.dtype(out_dtype).itemsize
    itm_attn = jnp.dtype(attn_dtype).itemsize

    # Advisory cost estimate (attention + per-head fc; projections run outside in XLA).
    flops = int(B * n_qt * n_head * (2 * tq * Lk * (d_k + d_v) + 2 * tq * d_v * D))
    transcendentals = int(B * n_head * Lq_pad * (Lk + 1))
    bytes_accessed = int(
        B * n_head * Lq_pad * d_k * itm_mm                      # Q proj tiles
        + B * n_head * Lk * (d_k + d_v) * itm_mm                # K/V proj (once per batch)
        + n_head * d_v * D * itm_mm + 2 * D * 4                 # resident weights
        + B * Lq_pad * D * (itm_in + itm_out)                   # residual in, out
        + (B * n_head * Lq_pad * Lk * itm_attn if return_attn else 0))

    # VMEM budget: double-buffered blocks + scratch + softmax temporaries, with
    # >= 16 MiB headroom below physical VMEM (64 MiB on v7x, 128 MiB on v5e/v6e).
    block_bytes = (
        2 * tq * d_k * itm_mm                                   # Q tile
        + 2 * n_head * Lk * (d_k + d_v) * itm_mm                # K/V slabs
        + 2 * tq * D * itm_in                                   # residual
        + 2 * n_head * d_v * D * itm_mm                         # fc weight
        + 4 * 2 * D * 4                                         # gamma/beta
        + 2 * tq * D * itm_out                                  # output
        + (2 * tq * Lk * itm_attn if return_attn else 0)        # attn output
        + tq * D * 4                                            # f32 accumulator scratch
        + 6 * tq * Lk * 4)                                      # softmax temporaries
    vmem_cap = max(phys_vmem - (16 << 20), 32 << 20)
    vmem_limit = int(min(max(block_bytes + (4 << 20), 32 << 20), vmem_cap))

    outs = pl.pallas_call(
        kernel,
        out_shape=tuple(out_shapes),
        grid_spec=pltpu.PrefetchScalarGridSpec(
            num_scalar_prefetch=0,
            grid=grid,
            in_specs=in_specs,
            out_specs=tuple(out_specs),
            scratch_shapes=[pltpu.VMEM((tq, D), jnp.float32)],
        ),
        compiler_params=pltpu.CompilerParams(
            dimension_semantics=("parallel", "parallel", "arbitrary"),
            vmem_limit_bytes=vmem_limit,
        ),
        cost_estimate=pl.CostEstimate(
            flops=flops, transcendentals=transcendentals,
            bytes_accessed=bytes_accessed),
    )(qp, kp, vp, resid, wfc_h, gamma2d, beta2d)

    out = outs[0][:, :Lq] if Lq_pad != Lq else outs[0]
    if return_attn:
        attn = outs[1][:, :, :Lq] if Lq_pad != Lq else outs[1]
        return out, attn
    return out


def _reference(q, k, v, params, *, n_head, d_k, d_v, eps=1e-6):
    """Pure-JAX reference mirroring the PyTorch forward (eval mode, mask=None)."""
    B, Lq, D = q.shape
    Lk = k.shape[1]
    Q = (q @ params["wq"]).reshape(B, Lq, n_head, d_k).transpose(0, 2, 1, 3)
    K = (k @ params["wk"]).reshape(B, Lk, n_head, d_k).transpose(0, 2, 1, 3)
    V = (v @ params["wv"]).reshape(B, Lk, n_head, d_v).transpose(0, 2, 1, 3)
    scores = jnp.einsum("bhqd,bhkd->bhqk", Q / (d_k ** 0.5), K)
    attn = jax.nn.softmax(scores, axis=-1)
    o = jnp.einsum("bhqk,bhkd->bhqd", attn, V).transpose(0, 2, 1, 3).reshape(B, Lq, -1)
    o = o @ params["wfc"] + q
    mu = o.mean(-1, keepdims=True)
    var = ((o - mu) ** 2).mean(-1, keepdims=True)
    o = (o - mu) / jnp.sqrt(var + eps) * params["gamma"] + params["beta"]
    return o, attn


if __name__ == "__main__":
    # Small shapes consistent with the module.
    B, L = 2, 8
    d_model, n_head, d_k, d_v = 32, 4, 8, 8

    key = jax.random.PRNGKey(0)
    kq, kk, kv, kw1, kw2, kw3, kw4, kq2 = jax.random.split(key, 8)

    q = jax.random.normal(kq, (B, L, d_model), jnp.float32)
    k = jax.random.normal(kk, (B, L, d_model), jnp.float32)
    v = jax.random.normal(kv, (B, L, d_model), jnp.float32)

    s = 1.0 / (d_model ** 0.5)
    params = {
        "wq": jax.random.normal(kw1, (d_model, n_head * d_k), jnp.float32) * s,
        "wk": jax.random.normal(kw2, (d_model, n_head * d_k), jnp.float32) * s,
        "wv": jax.random.normal(kw3, (d_model, n_head * d_v), jnp.float32) * s,
        "wfc": jax.random.normal(kw4, (n_head * d_v, d_model), jnp.float32) * s,
        "gamma": jnp.ones((d_model,), jnp.float32),   # LayerNorm default init
        "beta": jnp.zeros((d_model,), jnp.float32),
    }

    ref_out, ref_attn = _reference(q, k, v, params, n_head=n_head, d_k=d_k, d_v=d_v)

    # f32-MXU path (v5e-friendly): tight check vs the pure-JAX reference.
    out32, attn32 = multi_head_attention(
        q, k, v, params, n_head=n_head, d_k=d_k, d_v=d_v,
        matmul_dtype=jnp.float32, exp_dtype=jnp.float32, attn_dtype=jnp.float32)
    out32, attn32 = jax.block_until_ready((out32, attn32))
    assert out32.shape == (B, L, d_model) and attn32.shape == (B, n_head, L, L)
    assert jnp.allclose(out32, ref_out, atol=2e-2, rtol=2e-2)
    assert jnp.allclose(attn32, ref_attn, atol=2e-2, rtol=2e-2)

    # bf16-MXU production path (v6e/v7x): bf16 matmuls / exp / attn output, f32
    # softmax statistics, accumulation and LayerNorm -> looser tolerance.
    outbf, attnbf = multi_head_attention(
        q, k, v, params, n_head=n_head, d_k=d_k, d_v=d_v)
    outbf, attnbf = jax.block_until_ready((outbf, attnbf))
    assert jnp.allclose(outbf, ref_out, atol=6e-2, rtol=6e-2)
    assert jnp.allclose(attnbf.astype(jnp.float32), ref_attn, atol=6e-2, rtol=6e-2)

    # Ragged Lq (not a multiple of the tile, != Lk): exercises the padding/slicing path.
    Lq2 = 12
    q2 = jax.random.normal(kq2, (B, Lq2, d_model), jnp.float32)
    ref_out2, ref_attn2 = _reference(q2, k, v, params, n_head=n_head, d_k=d_k, d_v=d_v)
    out2, attn2 = multi_head_attention(
        q2, k, v, params, n_head=n_head, d_k=d_k, d_v=d_v,
        matmul_dtype=jnp.float32, exp_dtype=jnp.float32, attn_dtype=jnp.float32)
    out2, attn2 = jax.block_until_ready((out2, attn2))
    assert out2.shape == (B, Lq2, d_model) and attn2.shape == (B, n_head, Lq2, L)
    assert jnp.allclose(out2, ref_out2, atol=2e-2, rtol=2e-2)
    assert jnp.allclose(attn2, ref_attn2, atol=2e-2, rtol=2e-2)

    print("KERNEL_OK")
</pallas_src>

<mosaic_0001>
module attributes {stable_mosaic.version = 11 : i64} {
  func.func @kernel(%arg0: i32, %arg1: i32, %arg2: i32, %arg3: memref<1x1x8x8xf32, #tpu.memory_space<vmem>>, %arg4: memref<1x4x8x8xf32, #tpu.memory_space<vmem>>, %arg5: memref<1x4x8x8xf32, #tpu.memory_space<vmem>>, %arg6: memref<1x8x32xf32, #tpu.memory_space<vmem>>, %arg7: memref<4x8x32xf32, #tpu.memory_space<vmem>>, %arg8: memref<1x32xf32, #tpu.memory_space<vmem>>, %arg9: memref<1x32xf32, #tpu.memory_space<vmem>>, %arg10: memref<1x8x32xf32, #tpu.memory_space<vmem>>, %arg11: memref<1x1x8x8xf32, #tpu.memory_space<vmem>>, %arg12: memref<8x32xf32, #tpu.memory_space<vmem>>) attributes {dimension_semantics = [#tpu.dimension_semantics<parallel>, #tpu.dimension_semantics<parallel>, #tpu.dimension_semantics<arbitrary>], iteration_bounds = array<i64: 2, 1, 4>, scalar_prefetch = 0 : i64, scratch_operands = 1 : i64, tpu.core_type = #tpu.core_type<tc>, window_params = [{transform_indices = @transform_0, window_bounds = array<i64: 1, 1, 8, 8>}, {transform_indices = @transform_1, window_bounds = array<i64: 1, 4, 8, 8>}, {transform_indices = @transform_2, window_bounds = array<i64: 1, 4, 8, 8>}, {transform_indices = @transform_3, window_bounds = array<i64: 1, 8, 32>}, {pipeline_mode = #tpu.pipeline_mode<synchronous>, transform_indices = @transform_4, window_bounds = array<i64: 4, 8, 32>}, {pipeline_mode = #tpu.pipeline_mode<synchronous>, transform_indices = @transform_5, window_bounds = array<i64: 1, 32>}, {pipeline_mode = #tpu.pipeline_mode<synchronous>, transform_indices = @transform_6, window_bounds = array<i64: 1, 32>}, {transform_indices = @transform_7, window_bounds = array<i64: 1, 8, 32>}, {transform_indices = @transform_8, window_bounds = array<i64: 1, 1, 8, 8>}]} {
    %c0_i32 = arith.constant 0 : i32
    %0 = arith.cmpi eq, %arg2, %c0_i32 : i32
    %1 = arith.extui %0 : i1 to i32
    %c0_i32_0 = arith.constant 0 : i32
    %2 = arith.cmpi ne, %1, %c0_i32_0 : i32
    scf.if %2 {
      %cst_26 = arith.constant 0.000000e+00 : f32
      %38 = vector.broadcast %cst_26 : f32 to vector<8x32xf32>
      %c0_27 = arith.constant 0 : index
      %c0_28 = arith.constant 0 : index
      %39 = vector.load %arg12[%c0_27, %c0_28] : memref<8x32xf32, #tpu.memory_space<vmem>>, vector<8x32xf32>
      tpu.vector_store %arg12[%c0_27, %c0_28], %38 {strides = array<i32>} : memref<8x32xf32, #tpu.memory_space<vmem>>, vector<8x32xf32>,
    } else {
    }
    %c0 = arith.constant 0 : index
    %c0_1 = arith.constant 0 : index
    %c0_2 = arith.constant 0 : index
    %c0_3 = arith.constant 0 : index
    %3 = vector.load %arg3[%c0, %c0_1, %c0_2, %c0_3] : memref<1x1x8x8xf32, #tpu.memory_space<vmem>>, vector<1x1x8x8xf32>
    %4 = vector.shape_cast %3 : vector<1x1x8x8xf32> to vector<8x8xf32>
    %c0_4 = arith.constant 0 : index
    %5 = arith.index_cast %arg2 : i32 to index
    %c0_5 = arith.constant 0 : index
    %c0_6 = arith.constant 0 : index
    %6 = vector.load %arg4[%c0_4, %5, %c0_5, %c0_6] : memref<1x4x8x8xf32, #tpu.memory_space<vmem>>, vector<1x1x8x8xf32>
    %7 = vector.shape_cast %6 : vector<1x1x8x8xf32> to vector<8x8xf32>
    %c0_7 = arith.constant 0 : index
    %8 = arith.index_cast %arg2 : i32 to index
    %c0_8 = arith.constant 0 : index
    %c0_9 = arith.constant 0 : index
    %9 = vector.load %arg5[%c0_7, %8, %c0_8, %c0_9] : memref<1x4x8x8xf32, #tpu.memory_space<vmem>>, vector<1x1x8x8xf32>
    %10 = vector.shape_cast %9 : vector<1x1x8x8xf32> to vector<8x8xf32>
    %cst = arith.constant dense<0.000000e+00> : vector<8x8xf32>
    %11 = tpu.matmul %4, %7, %cst {dimension_numbers = #tpu.dot_dimension_numbers<[1], [1], [0], [0], [0, 0, 1, 0], [], []>} : vector<8x8xf32>, vector<8x8xf32>, vector<8x8xf32> -> vector<8x8xf32>
    %cst_10 = arith.constant 0.353553385 : f32
    %12 = vector.broadcast %cst_10 : f32 to vector<8x8xf32>
    %13 = arith.mulf %11, %12 : vector<8x8xf32>
    %cst_11 = arith.constant dense<0xFF800000> : vector<8xf32>
    %14 = vector.multi_reduction <maximumf>, %13, %cst_11 [1] : vector<8x8xf32> to vector<8xf32>
    %15 = vector.shape_cast %14 : vector<8xf32> to vector<8x1xf32>
    %16 = vector.broadcast %15 : vector<8x1xf32> to vector<8x8xf32>
    %17 = arith.subf %13, %16 : vector<8x8xf32>
    %18 = math.exp %17 : vector<8x8xf32>
    %cst_12 = arith.constant dense<0.000000e+00> : vector<8xf32>
    %19 = vector.multi_reduction <add>, %18, %cst_12 [1] : vector<8x8xf32> to vector<8xf32>
    %20 = vector.shape_cast %19 : vector<8xf32> to vector<8x1xf32>
    %21 = tpu.reciprocal %20 {approx = true} : vector<8x1xf32> -> vector<8x1xf32>
    %22 = vector.broadcast %21 : vector<8x1xf32> to vector<8x8xf32>
    %23 = arith.mulf %18, %22 : vector<8x8xf32>
    %c0_13 = arith.constant 0 : index
    %c0_14 = arith.constant 0 : index
    %c0_15 = arith.constant 0 : index
    %c0_16 = arith.constant 0 : index
    %24 = vector.load %arg11[%c0_13, %c0_14, %c0_15, %c0_16] : memref<1x1x8x8xf32, #tpu.memory_space<vmem>>, vector<1x1x8x8xf32>
    %25 = vector.shape_cast %24 : vector<1x1x8x8xf32> to vector<8x8xf32>
    %26 = vector.shape_cast %23 : vector<8x8xf32> to vector<1x1x8x8xf32>
    tpu.vector_store %arg11[%c0_13, %c0_14, %c0_15, %c0_16], %26 {strides = array<i32>} : memref<1x1x8x8xf32, #tpu.memory_space<vmem>>, vector<1x1x8x8xf32>,
    %cst_17 = arith.constant dense<0.000000e+00> : vector<8x8xf32>
    %27 = tpu.matmul %23, %10, %cst_17 {dimension_numbers = #tpu.dot_dimension_numbers<[1], [0], [0], [1], [0, 0, 1, 1], [], []>} : vector<8x8xf32>, vector<8x8xf32>, vector<8x8xf32> -> vector<8x8xf32>
    %c0_18 = arith.constant 0 : index
    %c0_19 = arith.constant 0 : index
    %28 = vector.load %arg12[%c0_18, %c0_19] : memref<8x32xf32, #tpu.memory_space<vmem>>, vector<8x32xf32>
    %29 = arith.index_cast %arg2 : i32 to index
    %c0_20 = arith.constant 0 : index
    %c0_21 = arith.constant 0 : index
    %30 = vector.load %arg7[%29, %c0_20, %c0_21] : memref<4x8x32xf32, #tpu.memory_space<vmem>>, vector<1x8x32xf32>
    %31 = vector.shape_cast %30 : vector<1x8x32xf32> to vector<8x32xf32>
    %cst_22 = arith.constant dense<0.000000e+00> : vector<8x32xf32>
    %32 = tpu.matmul %27, %31, %cst_22 {dimension_numbers = #tpu.dot_dimension_numbers<[1], [0], [0], [1], [0, 0, 1, 1], [], []>} : vector<8x8xf32>, vector<8x32xf32>, vector<8x32xf32> -> vector<8x32xf32>
    %33 = arith.addf %28, %32 : vector<8x32xf32>
    %c0_23 = arith.constant 0 : index
    %c0_24 = arith.constant 0 : index
    %34 = vector.load %arg12[%c0_23, %c0_24] : memref<8x32xf32, #tpu.memory_space<vmem>>, vector<8x32xf32>
    tpu.vector_store %arg12[%c0_23, %c0_24], %33 {strides = array<i32>} : memref<8x32xf32, #tpu.memory_space<vmem>>, vector<8x32xf32>,
    %c3_i32 = arith.constant 3 : i32
    %35 = arith.cmpi eq, %arg2, %c3_i32 : i32
    %36 = arith.extui %35 : i1 to i32
    %c0_i32_25 = arith.constant 0 : i32
    %37 = arith.cmpi ne, %36, %c0_i32_25 : i32
    scf.if %37 {
      %c0_26 = arith.constant 0 : index
      %c0_27 = arith.constant 0 : index
      %38 = vector.load %arg12[%c0_26, %c0_27] : memref<8x32xf32, #tpu.memory_space<vmem>>, vector<8x32xf32>
      %c0_28 = arith.constant 0 : index
      %c0_29 = arith.constant 0 : index
      %c0_30 = arith.constant 0 : index
      %39 = vector.load %arg6[%c0_28, %c0_29, %c0_30] : memref<1x8x32xf32, #tpu.memory_space<vmem>>, vector<1x8x32xf32>
      %40 = vector.shape_cast %39 : vector<1x8x32xf32> to vector<8x32xf32>
      %41 = arith.addf %38, %40 : vector<8x32xf32>
      %cst_31 = arith.constant dense<0.000000e+00> : vector<8xf32>
      %42 = vector.multi_reduction <add>, %41, %cst_31 [1] : vector<8x32xf32> to vector<8xf32>
      %43 = vector.shape_cast %42 : vector<8xf32> to vector<8x1xf32>
      %cst_32 = arith.constant 3.200000e+01 : f32
      %44 = vector.broadcast %cst_32 : f32 to vector<8x1xf32>
      %45 = arith.divf %43, %44 : vector<8x1xf32>
      %46 = vector.broadcast %45 : vector<8x1xf32> to vector<8x32xf32>
      %47 = arith.subf %41, %46 : vector<8x32xf32>
      %48 = arith.mulf %47, %47 : vector<8x32xf32>
      %cst_33 = arith.constant dense<0.000000e+00> : vector<8xf32>
      %49 = vector.multi_reduction <add>, %48, %cst_33 [1] : vector<8x32xf32> to vector<8xf32>
      %50 = vector.shape_cast %49 : vector<8xf32> to vector<8x1xf32>
      %cst_34 = arith.constant 3.200000e+01 : f32
      %51 = vector.broadcast %cst_34 : f32 to vector<8x1xf32>
      %52 = arith.divf %50, %51 : vector<8x1xf32>
      %53 = vector.broadcast %45 : vector<8x1xf32> to vector<8x32xf32>
      %54 = arith.subf %41, %53 : vector<8x32xf32>
      %cst_35 = arith.constant 9.99999997E-7 : f32
      %55 = vector.broadcast %cst_35 : f32 to vector<8x1xf32>
      %56 = arith.addf %52, %55 : vector<8x1xf32>
      %57 = math.rsqrt %56 : vector<8x1xf32>
      %58 = vector.broadcast %57 : vector<8x1xf32> to vector<8x32xf32>
      %59 = arith.mulf %54, %58 : vector<8x32xf32>
      %c0_36 = arith.constant 0 : index
      %c0_37 = arith.constant 0 : index
      %60 = vector.load %arg8[%c0_36, %c0_37] : memref<1x32xf32, #tpu.memory_space<vmem>>, vector<1x32xf32>
      %61 = vector.broadcast %60 : vector<1x32xf32> to vector<8x32xf32>
      %62 = arith.mulf %59, %61 : vector<8x32xf32>
      %c0_38 = arith.constant 0 : index
      %c0_39 = arith.constant 0 : index
      %63 = vector.load %arg9[%c0_38, %c0_39] : memref<1x32xf32, #tpu.memory_space<vmem>>, vector<1x32xf32>
      %64 = vector.broadcast %63 : vector<1x32xf32> to vector<8x32xf32>
      %65 = arith.addf %62, %64 : vector<8x32xf32>
      %c0_40 = arith.constant 0 : index
      %c0_41 = arith.constant 0 : index
      %c0_42 = arith.constant 0 : index
      %66 = vector.load %arg10[%c0_40, %c0_41, %c0_42] : memref<1x8x32xf32, #tpu.memory_space<vmem>>, vector<1x8x32xf32>
      %67 = vector.shape_cast %66 : vector<1x8x32xf32> to vector<8x32xf32>
      %68 = vector.shape_cast %65 : vector<8x32xf32> to vector<1x8x32xf32>
      tpu.vector_store %arg10[%c0_40, %c0_41, %c0_42], %68 {strides = array<i32>} : memref<1x8x32xf32, #tpu.memory_space<vmem>>, vector<1x8x32xf32>,
    } else {
    }
    return
  }
  func.func @transform_0(%arg0: i32, %arg1: i32, %arg2: i32) -> (i32, i32, i32, i32) {
    %c0_i32 = arith.constant 0 : i32
    %c0_i32_0 = arith.constant 0 : i32
    return %arg0, %arg2, %arg1, %c0_i32 : i32, i32, i32, i32
  }
  func.func @transform_1(%arg0: i32, %arg1: i32, %arg2: i32) -> (i32, i32, i32, i32) {
    %c0_i32 = arith.constant 0 : i32
    %c0_i32_0 = arith.constant 0 : i32
    %c0_i32_1 = arith.constant 0 : i32
    %c0_i32_2 = arith.constant 0 : i32
    return %arg0, %c0_i32, %c0_i32_0, %c0_i32_1 : i32, i32, i32, i32
  }
  func.func @transform_2(%arg0: i32, %arg1: i32, %arg2: i32) -> (i32, i32, i32, i32) {
    %c0_i32 = arith.constant 0 : i32
    %c0_i32_0 = arith.constant 0 : i32
    %c0_i32_1 = arith.constant 0 : i32
    %c0_i32_2 = arith.constant 0 : i32
    return %arg0, %c0_i32, %c0_i32_0, %c0_i32_1 : i32, i32, i32, i32
  }
  func.func @transform_3(%arg0: i32, %arg1: i32, %arg2: i32) -> (i32, i32, i32) {
    %c0_i32 = arith.constant 0 : i32
    %c0_i32_0 = arith.constant 0 : i32
    return %arg0, %arg1, %c0_i32 : i32, i32, i32
  }
  func.func @transform_4(%arg0: i32, %arg1: i32, %arg2: i32) -> (i32, i32, i32) {
    %c0_i32 = arith.constant 0 : i32
    %c0_i32_0 = arith.constant 0 : i32
    %c0_i32_1 = arith.constant 0 : i32
    %c0_i32_2 = arith.constant 0 : i32
    return %c0_i32, %c0_i32_0, %c0_i32_1 : i32, i32, i32
  }
  func.func @transform_5(%arg0: i32, %arg1: i32, %arg2: i32) -> (i32, i32) {
    %c0_i32 = arith.constant 0 : i32
    %c0_i32_0 = arith.constant 0 : i32
    %c0_i32_1 = arith.constant 0 : i32
    return %c0_i32, %c0_i32_0 : i32, i32
  }
  func.func @transform_6(%arg0: i32, %arg1: i32, %arg2: i32) -> (i32, i32) {
    %c0_i32 = arith.constant 0 : i32
    %c0_i32_0 = arith.constant 0 : i32
    %c0_i32_1 = arith.constant 0 : i32
    return %c0_i32, %c0_i32_0 : i32, i32
  }
  func.func @transform_7(%arg0: i32, %arg1: i32, %arg2: i32) -> (i32, i32, i32) {
    %c0_i32 = arith.constant 0 : i32
    %c0_i32_0 = arith.constant 0 : i32
    return %arg0, %arg1, %c0_i32 : i32, i32, i32
  }
  func.func @transform_8(%arg0: i32, %arg1: i32, %arg2: i32) -> (i32, i32, i32, i32) {
    %c0_i32 = arith.constant 0 : i32
    %c0_i32_0 = arith.constant 0 : i32
    return %arg0, %arg2, %arg1, %c0_i32 : i32, i32, i32, i32
  }
}

</mosaic_0001>

<bundles_post_ra>
// kernel: tpu_custom_call.1
= control target key start
LH: loop header
LB: loop body
LE: loop exit
PB: predicated region body
PF: predicated region fallthrough
CT: control target
= control target key end

     0   :  { %s2007_s0 = inlined_call_operand.hbm [shape: f32[2,4,8,8], index: 0, kind: input, shape index: {}]   ;;  %s2008_s1 = inlined_call_operand.hbm [shape: f32[2,4,8,8], index: 1, kind: input, shape index: {}]   ;;  %s2009_s2 = inlined_call_operand.hbm [shape: f32[2,4,8,8], index: 2, kind: input, shape index: {}]   ;;  %s2010_s3 = inlined_call_operand.hbm [shape: f32[2,8,32], index: 3, kind: input, shape index: {}]   ;;  %s2011_s4 = inlined_call_operand.hbm [shape: f32[4,8,32], index: 4, kind: input, shape index: {}]   ;;  %s2012_s5 = inlined_call_operand.vmem [shape: f32[1,32], index: 5, kind: input, shape index: {}]   ;;  %s2013_s6 = inlined_call_operand.vmem [shape: f32[1,32], index: 6, kind: input, shape index: {}]   ;;  %s2014_s7 = inlined_call_operand.hbm [shape: f32[2,8,32], index: 7, kind: output, shape index: {0}]   ;;  %s2015_s8 = inlined_call_operand.hbm [shape: f32[2,4,8,8], index: 8, kind: output, shape index: {1}]  }
   0x1   :  { %2046 = sst [smem:[#allocation34_spill]] %s2008_s1 }
   0x2   :  { %2047 = sst [smem:[#allocation35_spill]] %s2009_s2 }
   0x3   :  { %2048 = sst [smem:[#allocation36_spill]] %s2011_s4 }
   0x4   :  { %2049 = sst [smem:[#allocation37_spill]] %s2012_s5 }
   0x5   :  { %2050 = sst [smem:[#allocation38_spill]] %s2013_s6 }
   0x6   :  { %2051 = sst [smem:[#allocation39_spill]] %s2014_s7 }
   0x7   :  { %2052 = sst [smem:[#allocation40_spill]] %s2015_s8 }
   0x8   :  { %14 = vsyncpa [#allocation4], 0 }
   0x9   :  { %16 = vsyncpa [#allocation4 + $0x1], 0 }
   0xa   :  { %17 = vsyncpa [#allocation7], 0 }
   0xb   :  { %19 = vsyncpa [#allocation7 + $0x1], 0 }
   0xc   :  { %20 = vsyncpa [#allocation10], 0 }
   0xd   :  { %22 = vsyncpa [#allocation10 + $0x1], 0 }
   0xe   :  { %23 = vsyncpa [#allocation5], 0 }
   0xf   :  { %25 = vsyncpa [#allocation5 + $0x1], 0 }
  0x10   :  { %26 = vsyncpa [#allocation14], 0 }
  0x11   :  { %28 = vsyncpa [#allocation14 + $0x1], 0  ;;  %s1594_s27 = smov 0   ;;  %s1596_s28 = smov 0  }
  0x12   :  { %s1598_s29 = smov 0   ;;  %s1600_s30 = smov 0  }
  0x13   :  { %s1602_s9 = smov 0   ;;  %s1604_s10 = smov 0  }
  0x14   :  { %s1606_s11 = smov 0   ;;  %s1608_s12 = smov 0  }
  0x15   :  { %s1610_s13 = smov 0   ;;  %s1612_s14 = smov 0  }
  0x16   :  { %s1614_s15 = smov 0  }
  0x17 LB: > { %2053 = sst [smem:[#allocation21_spill]] %s1495_s27  ;;  %s1650_s16 = sadd.s32 4294967295, %s1535_s15   ;;  %s1535_s15 = sphi %s1614_s15, %s34_s15   ;;  %s1531_s14 = sphi %s1612_s14, %s2124_s14   ;;  %s1527_s13 = sphi %s1610_s13, %s2123_s13   ;;  %s1523_s12 = sphi %s1608_s12, %s2122_s12   ;;  %s1519_s11 = sphi %s1606_s11, %s2121_s11   ;;  %s1515_s10 = sphi %s1604_s10, %s2113_s10   ;;  %s1511_s9 = sphi %s1602_s9, %s2120_s9   ;;  %s1507_s30 = sphi %s1600_s30, %s2119_s30   ;;  %s1503_s29 = sphi %s1598_s29, %s2118_s29   ;;  %s1499_s28 = sphi %s1596_s28, %s2117_s28   ;;  %s1495_s27 = sphi %s1594_s27, %s2116_s27  }
  0x18   : > { %2054 = sst [smem:[#allocation22_spill]] %s1507_s30  ;;  %p2016_p0 = scmp.ne.s32.totalorder %s1499_s28, %s1495_s27 }
  0x19   : > { %2055 = sst [smem:[#allocation23_spill]] %s1515_s10  ;;  %p2036_p1 = scmp.eq.s32.totalorder %s1650_s16, 0 }
  0x1a   : > { %2056 = sst [smem:[#allocation24_spill]] %s1519_s11  ;;  %p1030_p2 = scmp.ge.s32.totalorder %s1535_s15, 1 }
  0x1b   : > { %2057 = sst [smem:[#allocation25_spill]] %s1523_s12  ;;  %p289_p3 = scmp.lt.s32.totalorder %s1535_s15, 9 }
  0x1c   : > { %2058 = sst [smem:[#allocation26_spill]] %s1650_s16  ;;  %p1662_p4 = por %p2016_p0, %p2036_p1 }
  0x1d   : > { %p1666_p5 = pnand %p1030_p2, %p289_p3  ;;  %s1537_s19 = smov [#allocation11]  }
  0x1e   : > { %s2059_s17 = scalar_select %p1662_p4, 1, 0 }
  0x1f   : > { %s301_s20 = sshll.u32 %s1537_s19, 4  ;;  %p1107_p6 = pneg %p1666_p5  ;;  %s302_s20 = int_to_ptr.vmem [resolvable:$true] %s301_s20 }
  0x20   : > { %2060 = sst [smem:[#allocation27_spill]] %s2059_s17  ;;  %p72_p8 = scmp.eq.s32.totalorder %s1535_s15, 0 }
  0x21   : > { %p1674_p7 = pnand %p1107_p6, %p2036_p1  ;;  %s1246_s22 = scalar_lea.vmem %s302_s20, 512 }
  0x22   : > { %p1247_p10 = scmp.ne.s32.totalorder %s302_s20, %s1246_s22  ;;  %p1254_p13 = scmp.lt.s32.totalorder %s302_s20, %s302_s20 }
  0x23   : > { %p1237_p9 = pneg %p1674_p7  ;;  %p1255_p2 = scmp.lt.s32.totalorder %s1246_s22, %s1246_s22 }
  0x25   : > { %p1249_p11 = pnand %p1247_p10, %p1237_p9  ;;  %p1256_p3 = por %p1255_p2, %p1254_p13 }
  0x27   : > { %p1250_p12 = pneg %p1249_p11 }
  0x29   : > { %p1257_p0 = pnand %p1256_p3, %p1250_p12 }
  0x2b   : > { %1260 = shalt.err (!%p1257_p0)
}
  0x2c   : > { %s2021_s23 = smov 128   ;;  %s2024_s24 = smov 8  }
  0x2d   : > { %s2063_s4 = sld [smem:[#allocation36_spill]]  ;;  %p97_p0 = scmp.ne.s32.totalorder %s1503_s29, %s1499_s28 }
  0x2e   : > { %p2026_p6 = scmp.lt.s32.totalorder %s1535_s15, 8  ;;  %s2027_s19 = sand.u32 1, %s1535_s15  }
  0x2f   : > { %s2023_s22 = sand.u32 1, %s1503_s29   ;;  %p99_p9 = por %p97_p0, %p72_p8 }
  0x30   : > { %s1036_s8 = sshll.u32 %s2023_s22, 5  ;;  %s1068_s7 = sshll.u32 %s1531_s14, 9 }
  0x31   : > { %s2064_s1 = sld [smem:[#allocation34_spill]]  ;;  %s346_s5 = scalar_lea.vmem [#allocation6], %s1036_s8 }
  0x32   : > { %s353_s11 = sshll.u32 %s346_s5, 4  ;;  %p1707_p10 = pnand %p2026_p6, %p99_p9  ;;  %s354_s11 = int_to_ptr.vmem [resolvable:$true] %s353_s11 }
  0x33   : > { %1110 = dma.hbm_to_vmem [thread:$0]  (!%p1674_p7), %s2063_s4, 512, %s302_s20, [#allocation10], %s2021_s23, %s2021_s23, %s2024_s24  }
  0x34   : > { %s2066_s2 = sld [smem:[#allocation35_spill]]  ;;  %s1718_s22 = scalar_lea.sflag [#allocation7], %s2027_s19 }
  0x35   : > { %p2028_p7 = pneg %p1707_p10  ;;  %s1274_s6 = scalar_lea.vmem %s354_s11, 512 }
  0x36   : > { %p1275_p11 = scmp.ne.s32.totalorder %s354_s11, %s1274_s6  ;;  %s1540_s5 = smov [#allocation6]  }
  0x37   : > { %s352_s21 = scalar_lea.hbm %s2064_s1, %s1068_s7  ;;  %s1279_s12 = sshll.u32 %s1540_s5, 4  ;;  %s1280_s12 = int_to_ptr.vmem [resolvable:$false] %s1279_s12 }
  0x38   : > { %p1277_p12 = pnand %p1275_p11, %p2028_p7  ;;  %s1281_s24 = scalar_lea.vmem %s1280_s12, 1024 }
  0x39   : > { %p1282_p2 = scmp.lt.s32.totalorder %s354_s11, %s1280_s12  ;;  %p1283_p3 = scmp.lt.s32.totalorder %s1281_s24, %s1274_s6 }
  0x3a   : > { %s1714_s23 = scalar_lea.hbm %s2066_s2, %s1068_s7  ;;  %p1278_p13 = pneg %p1277_p12 }
  0x3b   : > { %p1284_p9 = por %p1283_p3, %p1282_p2 }
  0x3d   : > { %p1285_p6 = pnand %p1284_p9, %p1278_p13 }
  0x3f   : > { %1288 = shalt.err (!%p1285_p6)
}
  0x40   : > { %s2067_s7 = smov 8   ;;  %s2068_s20 = smov 128  }
  0x41   : > { %1117 = dma.hbm_to_vmem [thread:$0]  (!%p1707_p10), %s352_s21, 512, %s354_s11, %s1718_s22, %s2068_s20, %s2068_s20, %s2067_s7  }
  0x42   : > { %s367_s24 = scalar_lea.vmem [#allocation8], %s1036_s8  ;;  %s1029_s6 = sadd.s32 4294967294, %s1535_s15  }
  0x43   : > { %s374_s26 = sshll.u32 %s367_s24, 4  ;;  %s46_s5 = sadd.s32 1, %s1527_s13  ;;  %s1731_s26 = int_to_ptr.vmem [resolvable:$true] %s374_s26 }
  0x44   : > { %p47_p6 = scmp.ge.s32.totalorder %s46_s5, 4  ;;  %s53_s12 = sadd.s32 1, %s1531_s14 }
  0x45   : > { %s64_s19 = sadd.s32 1, %s1515_s10  ;;  %p2029_p11 = scmp.ne.s32.totalorder %s1515_s10, %s1511_s9 }
  0x46   : > { %s2126_s5 = smov (%p47_p6, %s46_s5), 0  ;;  %s2128_s12 = smov (!%p47_p6, %s53_s12), %s1531_s14 }
  0x47   : > { %2069 = sst [smem:[#allocation28_spill]] %s2126_s5  ;;  %s58_s8 = ssub.s32 %s1527_s13, %s2126_s5 }
  0x48   : > { %p1749_p12 = por %p72_p8, %p2029_p11  ;;  %p55_p13 = scmp.ge.s32.totalorder %s2128_s12, 2 }
  0x49   : > { %p77_p2 = scmp.ne.s32.totalorder %s1511_s9, %s1507_s30  ;;  %s90_s21 = sadd.s32 1, %s1503_s29 }
  0x4a   : > { %p246_p3 = scmp.eq.s32.totalorder %s1650_s16, 7  ;;  %s2130_s12 = smov (%p55_p13, %s2128_s12), 0 }
  0x4b   : > { %2071 = sst [smem:[#allocation29_spill]] %s2130_s12  ;;  %p1764_p8 = por %p2036_p1, %p77_p2 }
  0x4c   : > { %p1771_p9 = por %p246_p3, %p97_p0  ;;  %s57_s2 = ssub.s32 %s1531_s14, %s2130_s12 }
  0x4d   : > { %p252_p6 = scmp.eq.s32.totalorder %s1029_s6, 7  ;;  %s59_s4 = sor.u32 %s58_s8, %s57_s2 }
  0x4e   : > { %s2073_s1 = scalar_select %p1771_p9, 1, 0 }
  0x4f   : > { %p88_p7 = scmp.eq.s32.totalorder %s57_s2, 0  ;;  %p62_p13 = scmp.eq.s32.totalorder %s59_s4, 0 }
  0x50   : > { %2074 = sst [smem:[#allocation30_spill]] %s2073_s1  ;;  %p2075_p11 = scmp.ne.s32.totalorder %s1499_s28, %s1495_s27 }
  0x51   : > { %s1785_s17 = scalar_select %p88_p7, %s1503_s29, %s90_s21  }
  0x52   : > { %p1780_p4 = por %p252_p6, %p2075_p11  ;;  %p2080_p0 = scmp.ne.s32.totalorder %s1515_s10, %s1511_s9 }
  0x53   : > { %2078 = sst [smem:[#allocation32_spill]] %s1785_s17  ;;  %p1800_p9 = por %p252_p6, %p77_p2 }
  0x54   : > { %s2076_s5 = scalar_select %p1780_p4, 1, 0 }
  0x55   : > { %s1788_s16 = scalar_select %p62_p13, %s1515_s10, %s64_s19  }
  0x56   : > { %2077 = sst [smem:[#allocation31_spill]] %s2076_s5  ;;  %p1793_p1 = por %p246_p3, %p2080_p0 }
  0x57   : > { %2079 = sst [smem:[#allocation33_spill]] %s1788_s16  ;;  %s321_s4 = sand.u32 1, %s1515_s10  }
  0x58   : > { %s2081_s6 = scalar_select %p1793_p1, 1, 0 }
  0x59   : > { %s2082_s2 = scalar_select %p1800_p9, 1, 0 }
  0x5a   : > { %s1034_s8 = sshll.u32 %s1531_s14, 2  ;;  %s1033_s12 = sshll.u32 %s321_s4, 3 }
  0x5b   : > { %s331_s5 = sadd.s32 %s1527_s13, %s1034_s8  ;;  %s325_s17 = scalar_lea.vmem [#allocation3], %s1033_s12 }
  0x5c   : > { %s1035_s21 = sshll.u32 %s331_s5, 7  ;;  %s335_s27 = sshll.u32 %s325_s17, 4  ;;  %s1812_s27 = int_to_ptr.vmem [resolvable:$true] %s335_s27 }
  0x5d   : > { %s1810_s1 = scalar_lea.hbm %s2007_s0, %s1035_s21  ;;  %p2083_p7 = scmp.lt.s32.totalorder %s1535_s15, 8 }
  0x5e   : > { %s1302_s10 = scalar_lea.vmem %s1731_s26, 512  ;;  %p2085_p3 = pneg %p1707_p10 }
  0x5f   : > { %p1818_p11 = pnand %p2083_p7, %p1749_p12  ;;  %p1303_p2 = scmp.ne.s32.totalorder %s1731_s26, %s1302_s10 }
  0x60   : > { %s1541_s17 = smov [#allocation8]  }
  0x61   : > { %p1305_p6 = pnand %p1303_p2, %p2085_p3  ;;  %s1307_s5 = sshll.u32 %s1541_s17, 4  ;;  %s1308_s5 = int_to_ptr.vmem [resolvable:$false] %s1307_s5 }
  0x62   : > { %s1309_s16 = scalar_lea.vmem %s1308_s5, 1024  ;;  %p1310_p0 = scmp.lt.s32.totalorder %s1731_s26, %s1308_s5 }
  0x63   : > { %p1306_p13 = pneg %p1305_p6  ;;  %p1311_p9 = scmp.lt.s32.totalorder %s1309_s16, %s1302_s10 }
  0x65   : > { %p1312_p4 = por %p1311_p9, %p1310_p0 }
  0x67   : > { %p1313_p1 = pnand %p1312_p4, %p1306_p13 }
  0x69   : > { %1316 = shalt.err (!%p1313_p1)
}
  0x6a   : > { %1120 = dma.hbm_to_vmem [thread:$0]  (!%p1707_p10), %s1714_s23, 512, %s1731_s26, %s1718_s22, %s2068_s20, %s2068_s20, %s2067_s7  }
  0x6b   : > { %s2086_s12 = sand.u32 1, %s1503_s29   ;;  %s322_s10 = scalar_lea.sflag [#allocation4], %s321_s4 }
  0x6c   : > { %s1042_s11 = sshll.u32 %s2086_s12, 3  ;;  %p1319_p4 = pneg %p1818_p11 }
  0x6d   : > { %s1330_s8 = scalar_lea.vmem %s1812_s27, 128  ;;  %s1542_s21 = smov [#allocation3]  }
  0x6e   : > { %p1331_p1 = scmp.ne.s32.totalorder %s1812_s27, %s1330_s8  ;;  %s1335_s19 = sshll.u32 %s1542_s21, 4  ;;  %s1336_s19 = int_to_ptr.vmem [resolvable:$false] %s1335_s19 }
  0x6f   : > { %s1337_s17 = scalar_lea.vmem %s1336_s19, 256  ;;  %p1338_p7 = scmp.lt.s32.totalorder %s1812_s27, %s1336_s19 }
  0x70   : > { %p1333_p12 = pnand %p1331_p1, %p1319_p4  ;;  %p1339_p2 = scmp.lt.s32.totalorder %s1337_s17, %s1330_s8 }
  0x72   : > { %p1334_p9 = pneg %p1333_p12  ;;  %p1340_p3 = por %p1339_p2, %p1338_p7 }
  0x74   : > { %p1341_p6 = pnand %p1340_p3, %p1334_p9 }
  0x76   : > { %1344 = shalt.err (!%p1341_p6)
}
  0x77   : > { %1114 = dma.hbm_to_vmem [thread:$0]  (!%p1818_p11), %s1810_s1, 128, %s1812_s27, %s322_s10  }
  0x78   : > { %s1043_s23 = sshll.u32 %s1531_s14, 7  ;;  %s388_s26 = scalar_lea.vmem [#allocation9], %s1042_s11 }
  0x79   : > { %s394_s20 = scalar_lea.hbm %s2010_s3, %s1043_s23  ;;  %s396_s4 = sshll.u32 %s388_s26, 4  ;;  %s397_s4 = int_to_ptr.vmem [resolvable:$true] %s396_s4 }
  0x7a   : > { %s2087_s5 = sand.u32 1, %s1535_s15   ;;  %s1358_s12 = scalar_lea.vmem %s397_s4, 128 }
  0x7b   : > { %s385_s16 = scalar_lea.sflag [#allocation10], %s2087_s5  ;;  %p1359_p13 = scmp.ne.s32.totalorder %s397_s4, %s1358_s12 }
  0x7c   : > { %p2088_p0 = pneg %p1707_p10  ;;  %s1543_s30 = smov [#allocation9]  }
  0x7d   : > { %s1363_s8 = sshll.u32 %s1543_s30, 4  ;;  %s1364_s8 = int_to_ptr.vmem [resolvable:$false] %s1363_s8 }
  0x7e   : > { %p1361_p4 = pnand %p1359_p13, %p2088_p0  ;;  %s1365_s1 = scalar_lea.vmem %s1364_s8, 256 }
  0x7f   : > { %p1366_p11 = scmp.lt.s32.totalorder %s397_s4, %s1364_s8  ;;  %p1367_p12 = scmp.lt.s32.totalorder %s1365_s1, %s1358_s12 }
  0x80   : > { %p1362_p1 = pneg %p1361_p4 }
  0x81   : > { %p1368_p9 = por %p1367_p12, %p1366_p11 }
  0x83   : > { %p1369_p7 = pnand %p1368_p9, %p1362_p1 }
  0x85   : > { %1372 = shalt.err (!%p1369_p7)
}
  0x86   : > { %1123 = dma.hbm_to_vmem [thread:$0]  (!%p1707_p10), %s394_s20, 128, %s397_s4, %s385_s16  }
  0x87   : > { %405 = sbr.rel (%p1666_p5) target bundleno = 1453 (0x5ad), region = 48  ;;  %s1861_s27 = sand.u32 (!%p1666_p5), 1, %s1511_s9  }
  0x88   : > { %s1045_s11 = sshll.u32 (!%p1666_p5), %s1861_s27, 3  ;;  %s408_s10 = scalar_lea.sflag (!%p1666_p5), [#allocation4], %s1861_s27 }
  0x89   : > { %s1865_s21 = scalar_lea.vmem (!%p1666_p5), [#allocation3], %s1045_s11 }
  0x8c   : > { %1470 = dma.done.wait (%p1764_p8), %s408_s10, 128  }
  0x8d   : > { %1472 = vsyncadd (%p1764_p8), %s408_s10, 4294967168  ;;  %s2089_s25 = sld [smem:[#allocation26_spill]]  ;;  %s1873_s17 = sand.u32 1, %s1499_s28  }
  0x8e   : > { %s2090_s19 = sld [smem:[#allocation27_spill]]  ;;  %s1046_s23 = sshll.u32 %s1873_s17, 5 }
  0x8f   : > { %s420_s7 = scalar_lea.vmem [#allocation6], %s1046_s23 }
  0x93   : > { %s416_s18 = sand.u32 1, %s2089_s25  }
  0x94   : > { %s417_s22 = scalar_lea.sflag [#allocation7], %s416_s18  ;;  %p2091_p5 = scmp.ne.s32.totalorder %s2090_s19, 0 }
  0x96   : > { %1474 = dma.done.wait (%p2091_p5), %s417_s22, 1024  }
  0x97   : > { %1476 = vsyncadd (%p2091_p5), %s417_s22, 4294966272  ;;  %s1048_s20 = sshll.u32 %s1873_s17, 3  ;;  %s1881_s24 = scalar_lea.vmem [#allocation8], %s1046_s23 }
  0x98   : > { %s435_s26 = scalar_lea.sflag [#allocation10], %s416_s18  ;;  %s1883_s4 = scalar_lea.vmem [#allocation9], %s1048_s20 }
  0x99   : > { %1478 = dma.done.wait (%p2091_p5), %s435_s26, 128  }
  0x9a   : > { %1480 = vsyncadd (%p2091_p5), %s435_s26, 4294967168  ;;  %p2092_p10 = scmp.eq.s32.totalorder %s2089_s25, 0 }
  0x9c   : > { %1482 = dma.done.wait (%p2092_p10), [#allocation10], 512   ;;  %p2093_p8 = pmov %p2092_p10 }
  0x9d   : > { %s1893_s5 = scalar_lea.vmem [#allocation12], %s1048_s20  ;;  %s1895_s16 = scalar_lea.vmem [#allocation13], %s1045_s11 }
  0x9e   : > { %1484 = vsyncadd (%p2093_p8), [#allocation10], 4294966784  ;;  %s2094_s12 = sld [smem:[#allocation24_spill]] }
  0xa4   : > { %p1052_p2 = scmp.ne.s32.totalorder %s2094_s12, 0 }
  0xa6   : > { %498 = sbr.rel (%p1052_p2) target bundleno = 173 (0xad), region = 72 }
  0xab   : > { %vm499_vm0 = vcmask 261120   ;;  %v1544_v0 = vmov 0.0  }
  0xac   : > { %500 = vst.msk [vmem:[#allocation2] sm:$0xff] %vm499_vm0, %v1544_v0 }
  0xad PF: > { %s2095_s30 = sld [smem:[#allocation24_spill]]  ;;  %vm507_vm1 = vcmask 64512   ;;  %v1545_v1 = vmov 0.0   ;;  %vm1546_vm2 = vmmov 0   ;;  %v501_v3 = vld [vmem:[%s1865_s21] sm:$0xff]  ;;  %vm747_vm3 = vcmask 261120  }
  0xae   : > { %1076 = vmatprep.subr.mxu0 %v1545_v1  ;;  %1078 = vmatprep.mubr.msk.f32.mxu0 %vm1546_vm2, %v1545_v1 }
  0xaf   : > { %1081 = vmatprep.subr.mxu1 %v1545_v1  ;;  %1083 = vmatprep.mubr.msk.f32.mxu1 %vm1546_vm2, %v1545_v1 }
  0xb3   : > { %s1899_s8 = sshll.u32 %s2095_s30, 3  ;;  %v670_v20 = vld [vmem:[#allocation2] sm:$0xff]  ;;  %p1058_p3 = scmp.ne.s32.totalorder %s2095_s30, 3 }
  0xb4   : > { %s503_s1 = scalar_lea.vmem %s420_s7, %s1899_s8 [#allocation6]  ;;  %s505_s11 = scalar_lea.vmem %s1881_s24, %s1899_s8 [#allocation8] }
  0xb5   : > { %v504_v2 = vld [vmem:[%s503_s1] sm:$0xff]  ;;  %s671_s10 = scalar_lea.vmem [#allocation11], %s1899_s8  ;;  %s2096_s19 = sld [smem:[#allocation37_spill]] (!%p1058_p3) }
  0xb6   : > { %1077 = vmatpush3.xpose.msk.msra.mxu0 %vm507_vm1, %v504_v2  ;;  %v506_v13 = vld [vmem:[%s505_s11] sm:$0xff]  ;;  %s2097_s22 = sld [smem:[#allocation38_spill]] (!%p1058_p3) }
  0xb7   : > { %1082 = vmatpush3.msra.mxu1 %v506_v13  ;;  %v672_v17 = vld [vmem:[%s671_s10] sm:$0xff] }
  0xb8   : > { %1086 = vmatprep.subr.mxu1 %v1545_v1 }
  0xb9   : > { %1079 = vmatmul.mubr.msk.f32.vlgmr.msra.gmra.mxu0 %vm507_vm1, %v501_v3 }
 0x179   : > { %v580_v4 = vpop.f32.mrf.mxu0 }
 0x17a   : > { %v584_v5 = vmul.f32 0.35355338, %v580_v4 }
 0x17b   : > { %v1080_v6 = vpop.f32.mrf.mxu0 }
 0x17c   : > { %v585_v7 = vsel %vm507_vm1, %v584_v5, -inf }
 0x17d   : > { %586 = vmax.xlane.f32.xlu0 %v585_v7 }
 0x206   : > { %v587_v8 = vpop.xlane.xlu0 %586 }
 0x207   : > { %v588_v9 = vsub.f32 %v584_v5, %v587_v8 }
 0x209   : > { %v589_v10 = vmul.f32 1.442695, %v588_v9 }
 0x20b   : > { %1229 = vpow2.f32 %v589_v10 }
 0x218   : > { %v1230_v11 = vpop.eup %1229 }
 0x219   : > { %v591_v12 = vsel %vm507_vm1, %v1230_v11, 0.0 }
 0x21a   : > { %592 = vadd.xlane.f32.xlu0 %v591_v12 }
 0x2a3   : > { %v593_v14 = vpop.xlane.xlu0 %592 }
 0x2a4   : > { %1231 = vrcp.f32 %v593_v14 }
 0x2b1   : > { %v1232_v15 = vpop.eup %1231 }
 0x2b2   : > { %v595_v16 = vmul.f32 %v1232_v15, %v1230_v11 }
 0x2b4   : > { %596 = vst.msk [vmem:[%s1895_s16] sm:$0xff] %vm507_vm1, %v595_v16  ;;  %1084 = vmatmul.mubr.msk.f32.vlgmr.msra.gmra.mxu1 %vm507_vm1, %v595_v16 }
 0x2b5   : > { %1087 = vmatpush3.msra.mxu1 %v672_v17  ;;  %1088 = vmatprep.mubr.msk.f32.mxu1 %vm1546_vm2, %v1545_v1 }
 0x374   : > { %v666_v18 = vpop.f32.mrf.mxu1 }
 0x375   : > { %1089 = vmatmul.mubr.msk.f32.vlgmr.msra.gmra.mxu1 %vm507_vm1, %v666_v18 }
 0x376   : > { %v1085_v19 = vpop.f32.mrf.mxu1 }
 0x434   : > { %752 = sbr.rel (%p1058_p3) target bundleno = 1399 (0x577), region = 76 }
 0x435   : > { %v742_v21 = vpop.f32.mrf.mxu1 }
 0x436   : > { %v746_v22 = vadd.f32 %v742_v21, %v670_v20 }
 0x437   : > { %v1090_v23 = vpop.f32.mrf.mxu1 }
 0x438   : > { %748 = vst.msk [vmem:[#allocation2] sm:$0xff] %vm747_vm3, %v746_v22 }
 0x439   : > { %v754_v25 = vld [vmem:[%s1883_s4] sm:$0xff] }
 0x43a   : > { %v1059_v37 = vld [vmem:[%s2096_s19] ss:$0 sm:$0xff] }
 0x43b   : > { %v1060_v39 = vld [vmem:[%s2097_s22] ss:$0 sm:$0xff] }
 0x43f   : > { %v753_v24 = vld [vmem:[#allocation2] sm:$0xff] }
 0x440   : > { %v755_v26 = vadd.f32 %v754_v25, %v753_v24 }
 0x442   : > { %v756_v27 = vsel %vm747_vm3, %v755_v26, 0.0 }
 0x443   : > { %757 = vadd.xlane.f32.xlu0 %v756_v27 }
 0x4cc   : > { %v758_v28 = vpop.xlane.xlu0 %757 }
 0x4cd   : > { %v760_v29 = vmul.f32 0.03125, %v758_v28 }
 0x4cf   : > { %v761_v30 = vsub.f32 %v755_v26, %v760_v29 }
 0x4d1   : > { %v762_v31 = vmul.f32 %v761_v30, %v761_v30 }
 0x4d3   : > { %v763_v32 = vsel %vm747_vm3, %v762_v31, 0.0 }
 0x4d4   : > { %764 = vadd.xlane.f32.xlu0 %v763_v32 }
 0x55d   : > { %v765_v33 = vpop.xlane.xlu0 %764 }
 0x55e   : > { %v766_v34 = vmul.f32 0.03125, %v765_v33 }
 0x560   : > { %v767_v35 = vadd.f32 1e-06, %v766_v34 }
 0x562   : > { %1233 = vrsqrt.f32 %v767_v35 }
 0x56f   : > { %v1234_v36 = vpop.eup %1233 }
 0x570   : > { %v769_v38 = vmul.f32 %v1234_v36, %v761_v30 }
 0x572   : > { %v777_v40 = vmul.f32 %v1059_v37, %v769_v38 }
 0x574   : > { %v785_v41 = vadd.f32 %v1060_v39, %v777_v40 }
 0x576   : > { %786 = vst.msk [vmem:[%s1893_s5] sm:$0xff] %vm747_vm3, %v785_v41 }
 0x577 PF: > { %s2098_s7 = sld [smem:[#allocation25_spill]]  ;;  %s807_s1 = sshll.u32 %s1893_s5, 4  ;;  %s808_s1 = int_to_ptr.vmem [resolvable:$true] %s807_s1 }
 0x578   : > { %s2099_s20 = sld [smem:[#allocation30_spill]]  ;;  %s788_s11 = scalar_lea.sflag [#allocation5], %s1873_s17 }
 0x579   : > { %s2100_s12 = sld [smem:[#allocation39_spill]]  ;;  %s1373_s10 = scalar_lea.vmem %s808_s1, 128 }
 0x57a   : > { %p1374_p6 = scmp.ne.s32.totalorder %s808_s1, %s1373_s10  ;;  %s1547_s21 = smov [#allocation12]  }
 0x57b   : > { %s1377_s25 = sshll.u32 %s1547_s21, 4  ;;  %s1378_s25 = int_to_ptr.vmem [resolvable:$false] %s1377_s25 }
 0x57c   : > { %s1379_s19 = scalar_lea.vmem %s1378_s25, 256  ;;  %p1380_p1 = scmp.lt.s32.totalorder %s808_s1, %s1378_s25 }
 0x57d   : > { %s1063_s24 = sshll.u32 %s2098_s7, 7  ;;  %p1381_p11 = scmp.lt.s32.totalorder %s1379_s19, %s1373_s10 }
 0x57e   : > { %p2102_p13 = scmp.ne.s32.totalorder %s2099_s20, 0 }
 0x57f   : > { %s2101_s8 = smov %s2100_s12  ;;  %s805_s30 = scalar_lea.hbm %s2100_s12, %s1063_s24 }
 0x580   : > { %p1375_p0 = pnand %p1374_p6, %p2102_p13  ;;  %p1382_p12 = por %p1381_p11, %p1380_p1 }
 0x582   : > { %p1376_p4 = pneg %p1375_p0 }
 0x584   : > { %p1383_p9 = pnand %p1382_p12, %p1376_p4 }
 0x586   : > { %1386 = shalt.err (!%p1383_p9)
}
 0x587   : > { %s1387_s18 = scalar_lea.hbm %s805_s30, 128  ;;  %s1391_s23 = scalar_lea.hbm %s2101_s8, 256 }
 0x588   : > { %p1388_p7 = scmp.ne.s32.totalorder %s805_s30, %s1387_s18  ;;  %p1392_p8 = scmp.lt.s32.totalorder %s805_s30, %s2101_s8 }
 0x589   : > { %p1393_p2 = scmp.lt.s32.totalorder %s1391_s23, %s1387_s18 }
 0x58a   : > { %p1389_p5 = pnand %p1388_p7, %p2102_p13 }
 0x58b   : > { %p1394_p3 = por %p1393_p2, %p1392_p8 }
 0x58c   : > { %p1390_p10 = pneg %p1389_p5 }
 0x58e   : > { %p1395_p6 = pnand %p1394_p3, %p1390_p10 }
 0x590   : > { %1398 = shalt.err (!%p1395_p6)
}
 0x591   : > { %s2103_s26 = sld [smem:[#allocation24_spill]]  ;;  %s1064_s4 = sshll.u32 %s2098_s7, 2 }
 0x592   : > { %1103 = dma.vmem_to_hbm [thread:$0]  (%p2102_p13), %s808_s1, 128, %s805_s30, %s788_s11  }
 0x593   : > { %s823_s12 = sshll.u32 %s1895_s16, 4  ;;  %s2104_s17 = sld [smem:[#allocation40_spill]]  ;;  %s824_s12 = int_to_ptr.vmem [resolvable:$true] %s823_s12 }
 0x594   : > { %s793_s5 = scalar_lea.sflag [#allocation14], %s1861_s27  ;;  %s1399_s23 = scalar_lea.vmem %s824_s12, 128 }
 0x595   : > { %p1400_p0 = scmp.ne.s32.totalorder %s824_s12, %s1399_s23  ;;  %p2105_p4 = scmp.ne.s32.totalorder %s2081_s6, 0 }
 0x596   : > { %s1548_s20 = smov [#allocation13]  }
 0x597   : > { %s819_s10 = sadd.s32 %s2103_s26, %s1064_s4  ;;  %p1401_p1 = pnand %p1400_p0, %p2105_p4 }
 0x598   : > { %s1065_s21 = sshll.u32 %s819_s10, 7  ;;  %s1403_s22 = sshll.u32 %s1548_s20, 4  ;;  %s1404_s22 = int_to_ptr.vmem [resolvable:$false] %s1403_s22 }
 0x599   : > { %s821_s18 = scalar_lea.hbm %s2104_s17, %s1065_s21  ;;  %p1402_p11 = pneg %p1401_p1 }
 0x59a   : > { %s1405_s24 = scalar_lea.vmem %s1404_s22, 256  ;;  %p1406_p13 = scmp.lt.s32.totalorder %s824_s12, %s1404_s22 }
 0x59b   : > { %p1407_p12 = scmp.lt.s32.totalorder %s1405_s24, %s1399_s23 }
 0x59d   : > { %p1408_p9 = por %p1407_p12, %p1406_p13 }
 0x59f   : > { %p1409_p7 = pnand %p1408_p9, %p1402_p11 }
 0x5a1   : > { %1412 = shalt.err (!%p1409_p7)
}
 0x5a2   : > { %s1413_s16 = scalar_lea.hbm %s821_s18, 128  ;;  %s1417_s30 = scalar_lea.hbm %s2104_s17, 1024 }
 0x5a3   : > { %p1414_p5 = scmp.ne.s32.totalorder %s821_s18, %s1413_s16  ;;  %p1418_p2 = scmp.lt.s32.totalorder %s821_s18, %s2104_s17 }
 0x5a4   : > { %p1419_p3 = scmp.lt.s32.totalorder %s1417_s30, %s1413_s16 }
 0x5a5   : > { %p1415_p10 = pnand %p1414_p5, %p2105_p4 }
 0x5a6   : > { %p1420_p6 = por %p1419_p3, %p1418_p2 }
 0x5a7   : > { %p1416_p8 = pneg %p1415_p10 }
 0x5a9   : > { %p1421_p0 = pnand %p1420_p6, %p1416_p8 }
 0x5ab   : > { %1424 = shalt.err (!%p1421_p0)
}
 0x5ac   : > { %1104 = dma.vmem_to_hbm [thread:$0]  (%p2105_p4), %s824_s12, 128, %s821_s18, %s793_s5  }
 0x5ad PF: > { %s2106_s26 = sld [smem:[#allocation21_spill]]  ;;  %p1134_p1 = scmp.ge.s32.totalorder %s1535_s15, 2 }
 0x5ae   : > { %s2107_s4 = sld [smem:[#allocation31_spill]] }
 0x5b3   : > { %s835_s10 = sand.u32 1, %s2106_s26  }
 0x5b4   : > { %p2108_p11 = scmp.ne.s32.totalorder %s2107_s4, 0  ;;  %s836_s21 = scalar_lea.sflag [#allocation5], %s835_s10 }
 0x5b6   : > { %p1125_p13 = pnand %p1134_p1, %p2108_p11 }
 0x5b8   : > { %p1126_p12 = pneg %p1125_p13 }
 0x5ba   : > { %1486 = dma.done.wait (%p1126_p12), %s836_s21, 128  }
 0x5bb   : > { %1488 = vsyncadd (%p1126_p12), %s836_s21, 4294967168  ;;  %s2109_s25 = sld [smem:[#allocation22_spill]]  ;;  %p2110_p9 = scmp.ne.s32.totalorder %s2082_s2, 0 }
 0x5bd   : > { %p1128_p7 = pnand %p1134_p1, %p2110_p9 }
 0x5bf   : > { %p1129_p5 = pneg %p1128_p7 }
 0x5c1   : > { %s844_s19 = sand.u32 1, %s2109_s25  }
 0x5c2   : > { %s845_s6 = scalar_lea.sflag [#allocation14], %s844_s19 }
 0x5c3   : > { %1490 = dma.done.wait (%p1129_p5), %s845_s6, 128  }
 0x5c4   : > { %1492 = vsyncadd (%p1129_p5), %s845_s6, 4294967168  ;;  %s34_s15 = sadd.s32 1, %s1535_s15   ;;  %s2111_s12 = sld [smem:[#allocation32_spill]] }
 0x5c5   : > { %p31_p4 = scmp.ge.s32.totalorder %s34_s15, 10   ;;  %s2112_s18 = sld [smem:[#allocation23_spill]] }
 0x5c6   : > { %s2113_s10 = sld [smem:[#allocation33_spill]]  ;;  %s2116_s27 = smov %s1499_s28 }
 0x5c7   : > { %s2114_s5 = sld [smem:[#allocation28_spill]]  ;;  %s2117_s28 = smov %s1503_s29 }
 0x5c8   : > { %s2115_s23 = sld [smem:[#allocation29_spill]]  ;;  %s2119_s30 = smov %s1511_s9 }
 0x5c9   : > { %s2121_s11 = smov %s1527_s13 }
 0x5ca   : > { %s2118_s29 = smov %s2111_s12  ;;  %s2122_s12 = smov %s1531_s14 }
 0x5cb   : > { %s2120_s9 = smov %s2112_s18  ;;  %33 = sbr.rel (!%p31_p4) target bundleno = 23 (0x17), region = 162 }
 0x5cd   : > { %s2123_s13 = smov %s2114_s5 }
 0x5ce   : > { %s2124_s14 = smov %s2115_s23 }
 0x5d0   :  { %850 = vsyncpa [#allocation4], 1 }
 0x5d1   :  { %852 = vsyncpa [#allocation4 + $0x1], 1 }
 0x5d2   :  { %853 = vsyncpa [#allocation7], 1 }
 0x5d3   :  { %855 = vsyncpa [#allocation7 + $0x1], 1 }
 0x5d4   :  { %856 = vsyncpa [#allocation10], 1 }
 0x5d5   :  { %858 = vsyncpa [#allocation10 + $0x1], 1 }
 0x5d6   :  { %859 = vsyncpa [#allocation5], 1 }
 0x5d7   :  { %861 = vsyncpa [#allocation5 + $0x1], 1 }
 0x5d8   :  { %862 = vsyncpa [#allocation14], 1 }
 0x5d9   :  { %864 = vsyncpa [#allocation14 + $0x1], 1 }

</bundles_post_ra>
